<compile_context>
chip_gen: v6e
topology: v6e:2x2x1
jax: 0.10.0
libtpu: 0.0.40
codegen_flags: <defaults>
</compile_context>

<pallas_src>
import functools

import jax
import jax.numpy as jnp
from jax.experimental import pallas as pl
from jax.experimental.pallas import tpu as pltpu


def _pow_static(sq, p):
    """sq ** p with cheap special cases (sq > 0 after the clamp)."""
    if p == 1.0:
        return sq
    if p == 0.5:
        return jnp.sqrt(sq)
    if p == 1.5:
        return sq * jnp.sqrt(sq)
    if float(p).is_integer() and 1.0 < p <= 4.0:
        out = sq
        for _ in range(int(p) - 1):
            out = out * sq
        return out
    return sq ** p  # generic fallback (EUP exp/log)


def _tv_kernel(mask_ref, x_ref, o_ref, *, eps, p, w, hw_eff):
    x = x_ref[...].astype(jnp.float32)                     # (block_rows, hw_eff)

    # Shifted neighbors via lane rotations (jnp.roll semantics):
    #   right[b, i] = x[b, i + 1]   -> neighbor along W
    #   down [b, i] = x[b, i + w]   -> neighbor along H
    # Wrap-around only ever lands on pixels the mask zeroes out.
    right = pltpu.roll(x, shift=hw_eff - 1, axis=1)
    down = pltpu.roll(x, shift=hw_eff - w, axis=1)

    dx = x - right
    dy = x - down
    sq = jnp.clip(dx * dx + dy * dy, eps, 1.0e7)
    # NOTE(v7x): the mask multiply + lane reduction could be offloaded to the
    # otherwise-idle MXU via jnp.dot(term, mask_col); kept on the VPU here
    # until a bundle dump confirms the vector-extended slot has slack.
    term = _pow_static(sq, p) * mask_ref[...]

    partial = jnp.sum(term)
    o_ref[...] = jnp.broadcast_to(partial, o_ref.shape).astype(o_ref.dtype)


def _vmem_capacity_bytes():
    try:
        return int(pltpu.get_tpu_info().vmem_capacity_bytes)
    except Exception:
        return 64 * 1024 * 1024  # conservative (v7x-sized) fallback


def _tv_rows_jax(xr, eps, p):
    """Plain-JAX TV term for a handful of leftover (h, w) slabs."""
    xd = xr[:, :-1, :-1] - xr[:, :-1, 1:]
    yd = xr[:, :-1, :-1] - xr[:, 1:, :-1]
    sq = jnp.clip(xd * xd + yd * yd, eps, 1.0e7)
    return jnp.sum(_pow_static(sq, p).astype(jnp.float32))


def tv_loss(x, eps=0.001, beta=2):
    """x: (N, C, H, W) array. Returns a scalar float32 loss."""
    n, c, h, w = x.shape
    nc, hw = n * c, h * w
    p = float(beta) / 2.0
    eps = float(eps)
    itemsize = x.dtype.itemsize

    # Lane axis: use the exact H*W extent when it is already lane aligned;
    # otherwise pad just that axis.
    # TODO(synk): drop this pad too (a block last-dim equal to the full hw is
    # legal even when hw % 128 != 0) once pltpu.roll on a ragged lane axis is
    # validated to lower efficiently.
    hw_eff = hw if hw % 128 == 0 else ((hw + 127) // 128) * 128

    # Generation-aware block / VMEM budget.
    vmem_cap = _vmem_capacity_bytes()
    if vmem_cap >= 96 * 1024 * 1024:          # v5e / v6e: 128 MiB physical VMEM
        target_block_bytes = 8 * 1024 * 1024
        vmem_limit = 96 * 1024 * 1024
    else:                                     # v7x: 64 MiB physical VMEM
        target_block_bytes = 4 * 1024 * 1024
        vmem_limit = 48 * 1024 * 1024

    # Native sublane tile for the input dtype (f32: 8, bf16: 16, int8/fp8: 32).
    sub = {1: 32, 2: 16}.get(itemsize, 8)

    rows_budget = max(1, target_block_bytes // (hw_eff * itemsize))
    if nc <= sub:
        block_rows = nc                       # single full-extent block
    else:
        block_rows = max(sub, (min(rows_budget, nc) // sub) * sub)
        if block_rows >= nc:                  # keep >= 2 blocks (v7x megacore)
            block_rows = max(sub, ((nc // 2) // sub) * sub)
    grid = nc // block_rows                   # full blocks only -> no partial blocks
    rem_rows = nc - grid * block_rows         # leftover rows -> tiny JAX epilogue
    # TODO(synk): for very large H*W (8 * hw * 4 B >> VMEM budget) a second
    # grid axis tiling hw with a w-lane halo would be needed.

    x2 = x.reshape(nc, hw)
    if hw_eff != hw:
        x2 = jnp.pad(x2, ((0, 0), (0, hw_eff - hw)))   # lane-axis pad only

    # Resident 0/1 mask over the (padded) flattened H*W axis: keep a pixel iff
    # it is a real pixel not in the last row or last column.
    idx = jnp.arange(hw_eff, dtype=jnp.int32)
    keep = (idx < hw) & ((idx % w) < (w - 1)) & ((idx // w) < (h - 1))
    mask = keep.astype(jnp.float32).reshape(1, hw_eff)

    # VMEM estimate: double-buffered input block + ~5 f32 temporaries + mask.
    est = (2 * block_rows * hw_eff * itemsize
           + 5 * block_rows * hw_eff * 4
           + hw_eff * 4 + (1 << 16))
    vmem_limit = min(max(vmem_limit, est), (vmem_cap * 3) // 4)

    kernel = functools.partial(_tv_kernel, eps=eps, p=p, w=w, hw_eff=hw_eff)

    partials = pl.pallas_call(
        kernel,
        out_shape=jax.ShapeDtypeStruct((grid, 8, 128), jnp.float32),
        grid_spec=pltpu.PrefetchScalarGridSpec(
            num_scalar_prefetch=0,
            grid=(grid,),
            in_specs=[
                # Pixel-validity mask: same tiny block every step (resident).
                pl.BlockSpec((1, hw_eff), lambda i: (0, 0)),
                # Large lane-dense data block: many slabs per grid step.
                pl.BlockSpec((block_rows, hw_eff), lambda i: (i, 0)),
            ],
            out_specs=pl.BlockSpec((1, 8, 128), lambda i: (i, 0, 0)),
        ),
        compiler_params=pltpu.CompilerParams(
            dimension_semantics=("parallel",),
            vmem_limit_bytes=int(vmem_limit),
        ),
    )(mask, x2)

    loss = jnp.sum(partials[:, 0, 0])
    if rem_rows > 0:
        xr = x.reshape(nc, h, w)[grid * block_rows:].astype(jnp.float32)
        loss = loss + _tv_rows_jax(xr, eps, p)
    return loss


def tv_loss_ref(x, eps=0.001, beta=2):
    """Pure-JAX reference mirroring the PyTorch module exactly."""
    x = x.astype(jnp.float32)
    x_diff = x[:, :, :-1, :-1] - x[:, :, :-1, 1:]
    y_diff = x[:, :, :-1, :-1] - x[:, :, 1:, :-1]
    sq = jnp.clip(x_diff * x_diff + y_diff * y_diff, eps, 1.0e7)
    p = beta / 2.0
    # torch.norm(sq, p) ** p == sum(|sq| ** p); sq > 0 after clamp.
    return jnp.sum(sq ** p)


if __name__ == "__main__":
    key = jax.random.PRNGKey(0)

    # Primary check: the module's nominal shape.
    x = jax.random.normal(key, (2, 4, 16, 16), dtype=jnp.float32)
    loss = jax.block_until_ready(tv_loss(x))
    ref = jax.block_until_ready(tv_loss_ref(x))
    assert jnp.allclose(loss, ref, rtol=1e-5, atol=1e-5), (loss, ref)

    # Secondary check: lane-padded H*W, multi-block grid, leftover-row epilogue
    # and a non-default beta (exercises the exponent special case).
    x2 = jax.random.normal(jax.random.PRNGKey(1), (5, 8, 7, 9), dtype=jnp.float32)
    loss2 = jax.block_until_ready(tv_loss(x2, beta=1))
    ref2 = jax.block_until_ready(tv_loss_ref(x2, beta=1))
    assert jnp.allclose(loss2, ref2, rtol=1e-4, atol=1e-4), (loss2, ref2)

    print("KERNEL_OK")
</pallas_src>

<mosaic_0001>
module attributes {stable_mosaic.version = 11 : i64} {
  func.func @_tv_kernel(%arg0: i32, %arg1: memref<1x256xf32, #tpu.memory_space<vmem>>, %arg2: memref<8x256xf32, #tpu.memory_space<vmem>>, %arg3: memref<1x8x128xf32, #tpu.memory_space<vmem>>) attributes {dimension_semantics = [#tpu.dimension_semantics<parallel>], iteration_bounds = array<i64: 1>, scalar_prefetch = 0 : i64, scratch_operands = 0 : i64, tpu.core_type = #tpu.core_type<tc>, window_params = [{pipeline_mode = #tpu.pipeline_mode<synchronous>, transform_indices = @transform_0, window_bounds = array<i64: 1, 256>}, {transform_indices = @transform_1, window_bounds = array<i64: 8, 256>}, {transform_indices = @transform_2, window_bounds = array<i64: 1, 8, 128>}]} {
    %c0 = arith.constant 0 : index
    %c0_0 = arith.constant 0 : index
    %0 = vector.load %arg2[%c0, %c0_0] : memref<8x256xf32, #tpu.memory_space<vmem>>, vector<8x256xf32>
    %c255_i32 = arith.constant 255 : i32
    %1 = tpu.dynamic_rotate %0 by %c255_i32 dim 1 : vector<8x256xf32>, i32 -> vector<8x256xf32>
    %c240_i32 = arith.constant 240 : i32
    %2 = tpu.dynamic_rotate %0 by %c240_i32 dim 1 : vector<8x256xf32>, i32 -> vector<8x256xf32>
    %3 = arith.subf %0, %1 : vector<8x256xf32>
    %4 = arith.subf %0, %2 : vector<8x256xf32>
    %5 = arith.mulf %3, %3 : vector<8x256xf32>
    %6 = arith.mulf %4, %4 : vector<8x256xf32>
    %7 = arith.addf %5, %6 : vector<8x256xf32>
    %cst = arith.constant 1.000000e-03 : f32
    %cst_1 = arith.constant 1.000000e+07 : f32
    %8 = vector.broadcast %cst : f32 to vector<8x256xf32>
    %9 = arith.maximumf %8, %7 : vector<8x256xf32>
    %10 = vector.broadcast %cst_1 : f32 to vector<8x256xf32>
    %11 = arith.minimumf %10, %9 : vector<8x256xf32>
    %c0_2 = arith.constant 0 : index
    %c0_3 = arith.constant 0 : index
    %12 = vector.load %arg1[%c0_2, %c0_3] : memref<1x256xf32, #tpu.memory_space<vmem>>, vector<1x256xf32>
    %13 = vector.broadcast %12 : vector<1x256xf32> to vector<8x256xf32>
    %14 = arith.mulf %11, %13 : vector<8x256xf32>
    %15 = vector.shape_cast %14 : vector<8x256xf32> to vector<1x8x256xf32>
    %cst_4 = arith.constant dense<0.000000e+00> : vector<1xf32>
    %16 = vector.multi_reduction <add>, %15, %cst_4 [1, 2] : vector<1x8x256xf32> to vector<1xf32>
    %17 = vector.shape_cast %16 : vector<1xf32> to vector<1x1x1xf32>
    %18 = vector.extract %17[0, 0, 0] : f32 from vector<1x1x1xf32>
    %19 = vector.broadcast %18 : f32 to vector<1x8x128xf32>
    %c0_5 = arith.constant 0 : index
    %c0_6 = arith.constant 0 : index
    %c0_7 = arith.constant 0 : index
    %20 = vector.load %arg3[%c0_5, %c0_6, %c0_7] : memref<1x8x128xf32, #tpu.memory_space<vmem>>, vector<1x8x128xf32>
    tpu.vector_store %arg3[%c0_5, %c0_6, %c0_7], %19 {strides = array<i32>} : memref<1x8x128xf32, #tpu.memory_space<vmem>>, vector<1x8x128xf32>,
    return
  }
  func.func @transform_0(%arg0: i32) -> (i32, i32) {
    %c0_i32 = arith.constant 0 : i32
    %c0_i32_0 = arith.constant 0 : i32
    %c0_i32_1 = arith.constant 0 : i32
    return %c0_i32, %c0_i32_0 : i32, i32
  }
  func.func @transform_1(%arg0: i32) -> (i32, i32) {
    %c0_i32 = arith.constant 0 : i32
    %c0_i32_0 = arith.constant 0 : i32
    return %arg0, %c0_i32 : i32, i32
  }
  func.func @transform_2(%arg0: i32) -> (i32, i32, i32) {
    %c0_i32 = arith.constant 0 : i32
    %c0_i32_0 = arith.constant 0 : i32
    %c0_i32_1 = arith.constant 0 : i32
    return %arg0, %c0_i32, %c0_i32_0 : i32, i32, i32
  }
}

</mosaic_0001>

<bundles_post_ra>
// kernel: tpu_custom_call.1
= control target key start
LH: loop header
LB: loop body
LE: loop exit
PB: predicated region body
PF: predicated region fallthrough
CT: control target
= control target key end

     0   :  { %7 = vsyncpa [#allocation3], 0  ;;  %s212_s0 = inlined_call_operand.hbm [shape: f32[1,256], index: 0, kind: input, shape index: {}]   ;;  %s213_s1 = inlined_call_operand.hbm [shape: f32[8,256], index: 1, kind: input, shape index: {}]   ;;  %s214_s2 = inlined_call_operand.hbm [shape: f32[1,8,128], index: 2, kind: output, shape index: {}]  }
   0x1   :  { %8 = vsyncpa [#allocation6], 0 }
   0x2   :  { %9 = vsyncpa [#allocation4], 0  ;;  %s183_s9 = smov [#allocation2]   ;;  %s184_s11 = smov [#allocation5]  }
   0x3   :  { %s16_s10 = sshll.u32 %s183_s9, 4  ;;  %s26_s12 = sshll.u32 %s184_s11, 4  ;;  %s17_s10 = int_to_ptr.vmem [resolvable:$true] %s16_s10  ;;  %s27_s12 = int_to_ptr.vmem [resolvable:$true] %s26_s12 }
   0x4   :  { %s125_s13 = scalar_lea.vmem %s17_s10, 32  ;;  %p130_p1 = scmp.lt.s32.totalorder %s17_s10, %s17_s10 }
   0x5   :  { %p126_p0 = scmp.ne.s32.totalorder %s17_s10, %s125_s13  ;;  %p131_p2 = scmp.lt.s32.totalorder %s125_s13, %s125_s13 }
   0x7   :  { %p132_p3 = por %p131_p2, %p130_p1 }
   0x9   :  { %p133_p4 = pnand %p132_p3, %p126_p0 }
   0xb   :  { %136 = shalt.err (!%p133_p4)
}
   0xc   :  { %19 = dma.hbm_to_vmem [thread:$0]  %s212_s0, 32, %s17_s10, [#allocation3]  }
   0xd   :  { %s145_s16 = scalar_lea.vmem %s27_s12, 256  ;;  %p150_p6 = scmp.lt.s32.totalorder %s27_s12, %s27_s12 }
   0xe   :  { %p146_p5 = scmp.ne.s32.totalorder %s27_s12, %s145_s16  ;;  %p151_p7 = scmp.lt.s32.totalorder %s145_s16, %s145_s16 }
  0x10   :  { %p152_p8 = por %p151_p7, %p150_p6 }
  0x12   :  { %p153_p9 = pnand %p152_p8, %p146_p5 }
  0x14   :  { %156 = shalt.err (!%p153_p9)
}
  0x15   :  { %29 = dma.hbm_to_vmem [thread:$0]  %s213_s1, 256, %s27_s12, [#allocation6]  }
  0x16   :  { %177 = dma.done.wait [#allocation3], 32  }
  0x17   :  { %178 = vsyncadd [#allocation3], 4294967264 }
  0x18   :  { %179 = dma.done.wait [#allocation6], 256  }
  0x19   :  { %180 = vsyncadd [#allocation6], 4294967040  ;;  %v36_v0 = vld [vmem:[#allocation5] sm:$0xff]  ;;  %s185_s19 = smov 112   ;;  %s186_s20 = smov 127   ;;  %v37_v1 = vld [vmem:[#allocation5 + $0x8] sm:$0xff]  ;;  %v42_v2 = vlaneseq }
  0x1a   :  { %47 = vrot.lane.b32.xlu1 %v36_v0, %s185_s19  ;;  %38 = vrot.lane.b32.xlu0 %v36_v0, %s186_s20  ;;  %v68_v23 = vld [vmem:[#allocation2] sm:$0x3]  ;;  %s187_s0 = smov [#allocation7]  }
  0x1b   :  { %v43_v3 = vand.u32 127, %v42_v2  ;;  %v71_v6 = vshrl.u32 %v42_v2, 7  ;;  %s100_s1 = sshll.u32 %s187_s0, 4  ;;  %s101_s1 = int_to_ptr.vmem [resolvable:$true] %s100_s1 }
  0x1c   :  { %s157_s22 = scalar_lea.vmem %s101_s1, 128  ;;  %p162_p11 = scmp.lt.s32.totalorder %s101_s1, %s101_s1 }
  0x1d   :  { %vm51_vm0 = vcmp.lt.s32.totalorder %v43_v3, 112  ;;  %vm44_vm1 = vcmp.lt.s32.totalorder %v43_v3, 127  ;;  %v72_v17 = vsub.s32 0, %v71_v6  ;;  %v76_v18 = vsub.s32 1, %v71_v6  ;;  %p158_p10 = scmp.ne.s32.totalorder %s101_s1, %s157_s22  ;;  %p163_p12 = scmp.lt.s32.totalorder %s157_s22, %s157_s22 }
  0x1e   :  { %49 = vrot.lane.b32.xlu1 %v37_v1, %s185_s19  ;;  %40 = vrot.lane.b32.xlu0 %v37_v1, %s186_s20 }
  0x1f   :  { %v73_v28 = vrot.slane %v68_v23, %v72_v17  ;;  %v77_v29 = vrot.slane %v68_v23, %v76_v18  ;;  %p164_p13 = por %p163_p12, %p162_p11 }
  0x21   :  { %p165_p0 = pnand %p164_p13, %p158_p10 }
  0x8c   :  { %v48_v4 = vpop.permute.xlu1 %47  ;;  %v39_v5 = vpop.permute.xlu0 %38 }
  0x90   :  { %v50_v7 = vpop.permute.xlu1 %49  ;;  %v41_v8 = vpop.permute.xlu0 %40 }
  0x91   :  { %v52_v9 = vsel %vm51_vm0, %v48_v4, %v50_v7  ;;  %v53_v10 = vsel %vm51_vm0, %v50_v7, %v48_v4  ;;  %v45_v11 = vsel %vm44_vm1, %v39_v5, %v41_v8  ;;  %v46_v12 = vsel %vm44_vm1, %v41_v8, %v39_v5 }
  0x92   :  { %v56_v13 = vsub.f32 %v36_v0, %v52_v9  ;;  %v57_v14 = vsub.f32 %v37_v1, %v53_v10  ;;  %v54_v15 = vsub.f32 %v36_v0, %v45_v11  ;;  %v55_v16 = vsub.f32 %v37_v1, %v46_v12 }
  0x94   :  { %v60_v19 = vmul.f32 %v56_v13, %v56_v13  ;;  %v61_v20 = vmul.f32 %v57_v14, %v57_v14  ;;  %v58_v21 = vmul.f32 %v54_v15, %v54_v15  ;;  %v59_v22 = vmul.f32 %v55_v16, %v55_v16 }
  0x96   :  { %v62_v24 = vadd.f32 %v60_v19, %v58_v21  ;;  %v63_v25 = vadd.f32 %v61_v20, %v59_v22 }
  0x98   :  { %v64_v26 = vmax.f32 %v62_v24, 0.001  ;;  %v65_v27 = vmax.f32 %v63_v25, 0.001 }
  0x9a   :  { %v66_v30 = vmin.f32 %v64_v26, 10000000.0  ;;  %v67_v31 = vmin.f32 %v65_v27, 10000000.0 }
  0x9c   :  { %v80_v32 = vmul.f32 %v73_v28, %v66_v30  ;;  %v81_v33 = vmul.f32 %v77_v29, %v67_v31 }
  0x9e   :  { %v82_v34 = vadd.f32 %v81_v33, %v80_v32 }
  0xa0   :  { %83 = vadd.xlane.f32.xlu0 %v82_v34 }
 0x129   :  { %v84_v35 = vpop.xlane.xlu0 %83 }
 0x12a   :  { %v85_v36 = vrot.slane %v84_v35, 4 }
 0x12c   :  { %v86_v37 = vadd.f32 %v85_v36, %v84_v35 }
 0x12e   :  { %v87_v38 = vrot.slane %v86_v37, 2 }
 0x130   :  { %v88_v39 = vadd.f32 %v87_v38, %v86_v37 }
 0x132   :  { %v89_v40 = vrot.slane %v88_v39, 1 }
 0x134   :  { %v90_v41 = vadd.f32 %v89_v40, %v88_v39 }
 0x136   :  { %110 = vpush %v90_v41 }
 0x167   :  { %s111_s21 = spop %110 }
 0x168   :  { %v92_v42 = vstv %s111_s21 }
 0x169   :  { %93 = vst [vmem:[#allocation7] sm:$0xff] %v92_v42 }
 0x16a   :  { %168 = shalt.err (!%p165_p0)
}
 0x16b   :  { %103 = dma.vmem_to_hbm [thread:$0]  %s101_s1, 128, %s214_s2, [#allocation4]  }
 0x16c   :  { %181 = dma.done.wait [#allocation4], 128  }
 0x16d   :  { %182 = vsyncadd [#allocation4], 4294967168 }
 0x16e   :  { %107 = vsyncpa [#allocation3], 1 }
 0x16f   :  { %108 = vsyncpa [#allocation6], 1 }
 0x170   :  { %109 = vsyncpa [#allocation4], 1 }

</bundles_post_ra>
